<compile_context>
chip_gen: v7x
topology: tpu7x:2x2x1
jax: 0.10.0
libtpu: 0.0.40
codegen_flags: <defaults>
</compile_context>

<pallas_src>
import jax
import jax.numpy as jnp
from jax.experimental import pallas as pl
from jax.experimental.pallas import tpu as pltpu

# VP schedule hyperparameters (defaults of the wrapped diffusion model)
BETA_D = 19.9
BETA_MIN = 0.1
M_STEPS = 1000
HIDDEN = 32      # hidden channels of the synthetic inner denoiser
C_OUT = 3        # the UNet wrapper returns the first 3 channels

# ~2 MiB f32 x-block at the cap; measured tiling curve says >=1 MiB blocks run
# at ~85% of HBM roofline while per-step pipeline overhead (~0.35 us) amortizes.
_MAX_HW_TILE = 128 * 1024


def sigma_of_t(t):
    t = jnp.asarray(t, jnp.float32)
    return jnp.sqrt(jnp.exp(0.5 * BETA_D * t ** 2 + BETA_MIN * t) - 1.0)


def sigma_inv(s):
    s = jnp.asarray(s, jnp.float32)
    return (jnp.sqrt(BETA_MIN ** 2 + 2.0 * BETA_D * jnp.log1p(s ** 2)) - BETA_MIN) / BETA_D


def _pick_hw_tile(hw):
    """Large lane-dense HW tile; a pl.cdiv grid handles any remainder."""
    if hw <= 128:
        return hw                                  # full-dim block (exempt from lane rule)
    return min(_MAX_HW_TILE, (hw // 128) * 128)    # multiple of 128, never exceeds HW


def unet_forward(x_nchw, t, params, *, use_bf16_mxu=False):
    """Pallas forward of UNet.forward(x, t): inner denoiser on (x, broadcast t), first 3 channels."""
    w1, b1, w2, b2 = params           # w1:(C,HIDDEN)  b1:(HIDDEN,)  w2:(HIDDEN,C)  b2:(C,)
    N, C, H, W = x_nchw.shape
    HW = H * W
    hw_tile = _pick_hw_tile(HW)
    n_hw = pl.cdiv(HW, hw_tile)

    # Keep NCHW; flattening spatial is a free reshape and x stays in its native
    # dtype (upcast happens in VMEM inside the kernel).
    x = x_nchw.reshape(N, C, HW)

    # ---- tiny scalar schedule glue (stays in plain JAX) ----
    # torch.tensor([t]): a single scalar timestep broadcast over the batch.
    t = jnp.broadcast_to(jnp.asarray(t, jnp.float32).reshape(-1)[:1], (N,))
    sigma = sigma_of_t(t)                                   # (N,)
    c_in = 1.0 / jnp.sqrt(sigma ** 2 + 1.0)
    c_out = -sigma
    c_noise = (M_STEPS - 1) * sigma_inv(sigma)              # (N,)
    freqs = jnp.exp(-jnp.arange(HIDDEN, dtype=jnp.float32) * (jnp.log(1000.0) / HIDDEN))
    temb_b1 = jnp.sin(c_noise[:, None] * freqs[None, :]) + b1      # (N, HIDDEN)

    # Fold every per-batch scalar into two tiny per-batch operands so the hot
    # pipeline only streams x in / out:
    #   wb1[n] = [ c_in[n] * w1^T  |  temb[n]+b1 ]                (HIDDEN, C+1)
    #   wb2[n] = [ c_out[n] * w2^T[:3]  |  c_out[n]*b2[:3] ]      (C_OUT, HIDDEN+1)
    w1s = c_in[:, None, None] * w1.T[None, :, :]                    # (N, HIDDEN, C)
    wb1 = jnp.concatenate([w1s, temb_b1[:, :, None]], axis=2)       # (N, HIDDEN, C+1)
    w2s = c_out[:, None, None] * w2.T[None, :C_OUT, :]              # (N, C_OUT, HIDDEN)
    b2s = (c_out[:, None] * b2[None, :C_OUT])[:, :, None]           # (N, C_OUT, 1)
    wb2 = jnp.concatenate([w2s, b2s], axis=2)                       # (N, C_OUT, HIDDEN+1)

    # bf16 MXU operands are a v6e/v7x lever once tiles are large (K=4 f32 MXU
    # decomposition / EUP pressure); default f32 keeps the 1e-3 tolerance safe.
    mm_dtype = jnp.bfloat16 if use_bf16_mxu else jnp.float32

    def kernel(x_ref, wb1_ref, wb2_ref, o_ref):
        """One grid step = one batch element x one lane-dense HW tile."""
        x_tile = x_ref[0].astype(jnp.float32)                    # (C, T), lane-dense
        # ---- F(c_in*x, c_noise): 1x1-conv channel MLP, weight-on-left so the
        # wide HW axis is the MXU result dim; c_in / temb / b1 pre-folded. ----
        w1k = wb1_ref[0, :, :C].astype(mm_dtype)                  # (HIDDEN, C)
        h = jnp.dot(w1k, x_tile.astype(mm_dtype),
                    preferred_element_type=jnp.float32)           # (HIDDEN, T)
        h = h + wb1_ref[0, :, C:]                                 # (HIDDEN, 1) bcast over lanes
        h = h * jax.nn.sigmoid(h)                                 # SiLU (EUP)
        w2k = wb2_ref[0, :, :HIDDEN].astype(mm_dtype)             # (C_OUT, HIDDEN)
        f = jnp.dot(w2k, h.astype(mm_dtype),
                    preferred_element_type=jnp.float32)           # (C_OUT, T)
        f = f + wb2_ref[0, :, HIDDEN:]                            # (C_OUT, 1) bcast over lanes
        # ---- D = c_skip*x + c_out*F (c_skip == 1, c_out folded into w2k/bias)
        # and the wrapper's [:, :3] channel slice, all fused. ----
        o_ref[0] = (x_tile[:C_OUT] + f).astype(o_ref.dtype)

    out = pl.pallas_call(
        kernel,
        out_shape=jax.ShapeDtypeStruct((N, C_OUT, HW), x_nchw.dtype),
        grid=(N, n_hw),
        in_specs=[
            # x is the only streamed operand; partial last block OK (per-lane math).
            # TODO(synk): if xprof still shows exposed DMA, sweep pipeline_mode=pl.Buffered(3) here.
            pl.BlockSpec((1, C, hw_tile), lambda n, h: (n, 0, h)),
            pl.BlockSpec((1, HIDDEN, C + 1), lambda n, h: (n, 0, 0)),      # folded w1 / temb+b1
            pl.BlockSpec((1, C_OUT, HIDDEN + 1), lambda n, h: (n, 0, 0)),  # folded w2 / b2 (x c_out)
        ],
        out_specs=pl.BlockSpec((1, C_OUT, hw_tile), lambda n, h: (n, 0, h)),
        compiler_params=pltpu.CompilerParams(
            dimension_semantics=("parallel", "parallel")),
    )(x, wb1, wb2)

    # TODO(synk): output cannot alias x via input_output_aliases (3 output vs C input channels).
    return out.reshape(N, C_OUT, H, W)


def unet_ref(x_nchw, t, params):
    """Pure-JAX reference of the same forward (original NHWC math + [:, :3] slice)."""
    w1, b1, w2, b2 = params
    N, C, H, W = x_nchw.shape
    t = jnp.broadcast_to(jnp.asarray(t, jnp.float32).reshape(-1)[:1], (N,))
    sigma = sigma_of_t(t)
    c_in = (1.0 / jnp.sqrt(sigma ** 2 + 1.0)).reshape(N, 1, 1, 1)
    c_out = (-sigma).reshape(N, 1, 1, 1)
    c_noise = (M_STEPS - 1) * sigma_inv(sigma)
    freqs = jnp.exp(-jnp.arange(HIDDEN, dtype=jnp.float32) * (jnp.log(1000.0) / HIDDEN))
    temb = jnp.sin(c_noise[:, None] * freqs[None, :])
    x_in = jnp.transpose(c_in * x_nchw, (0, 2, 3, 1)).reshape(N, H * W, C)
    h = x_in @ w1 + b1 + temb[:, None, :]
    h = h * jax.nn.sigmoid(h)
    f = h @ w2 + b2
    f = jnp.transpose(f.reshape(N, H, W, C), (0, 3, 1, 2))
    d = x_nchw + c_out * f
    return d[:, :C_OUT]


def init_params(key, C):
    k1, k2, k3, k4 = jax.random.split(key, 4)
    w1 = jax.random.normal(k1, (C, HIDDEN), jnp.float32) * (1.0 / jnp.sqrt(C))
    b1 = jax.random.normal(k2, (HIDDEN,), jnp.float32) * 0.1
    w2 = jax.random.normal(k3, (HIDDEN, C), jnp.float32) * (1.0 / jnp.sqrt(HIDDEN))
    b2 = jax.random.normal(k4, (C,), jnp.float32) * 0.1
    return (w1, b1, w2, b2)


if __name__ == "__main__":
    key = jax.random.PRNGKey(0)
    kx, kt, kp = jax.random.split(key, 3)

    N, C, H, W = 2, 4, 16, 16
    x = jax.random.normal(kx, (N, C, H, W), jnp.float32)
    t = float(jax.random.uniform(kt, (), jnp.float32, minval=0.05, maxval=1.0))  # scalar timestep
    params = init_params(kp, C)

    out = unet_forward(x, t, params)
    out = jax.block_until_ready(out)

    ref = unet_ref(x, t, params)
    assert out.shape == (N, C_OUT, H, W) and out.dtype == jnp.float32
    assert jnp.allclose(out, ref, atol=1e-3, rtol=1e-3), "Pallas kernel mismatch vs JAX reference"

    # TODO(synk): conditional / class-label paths of the wrapped unet are not exercised
    # (the wrapper never passes labels).
    print("KERNEL_OK")
</pallas_src>

<mosaic_0001>
module attributes {stable_mosaic.version = 11 : i64} {
  func.func @kernel(%arg0: i32, %arg1: i32, %arg2: memref<1x4x256xf32, #tpu.memory_space<vmem>>, %arg3: memref<1x32x5xf32, #tpu.memory_space<vmem>>, %arg4: memref<1x3x33xf32, #tpu.memory_space<vmem>>, %arg5: memref<1x3x256xf32, #tpu.memory_space<vmem>>) attributes {dimension_semantics = [#tpu.dimension_semantics<parallel>, #tpu.dimension_semantics<parallel>], iteration_bounds = array<i64: 2, 1>, scalar_prefetch = 0 : i64, scratch_operands = 0 : i64, tpu.core_type = #tpu.core_type<tc>, window_params = [{transform_indices = @transform_0, window_bounds = array<i64: 1, 4, 256>}, {transform_indices = @transform_1, window_bounds = array<i64: 1, 32, 5>}, {transform_indices = @transform_2, window_bounds = array<i64: 1, 3, 33>}, {transform_indices = @transform_3, window_bounds = array<i64: 1, 3, 256>}]} {
    %c0 = arith.constant 0 : index
    %c0_0 = arith.constant 0 : index
    %c0_1 = arith.constant 0 : index
    %0 = vector.load %arg2[%c0, %c0_0, %c0_1] : memref<1x4x256xf32, #tpu.memory_space<vmem>>, vector<1x4x256xf32>
    %1 = vector.shape_cast %0 : vector<1x4x256xf32> to vector<4x256xf32>
    %c0_2 = arith.constant 0 : index
    %c0_3 = arith.constant 0 : index
    %c0_4 = arith.constant 0 : index
    %2 = vector.load %arg3[%c0_2, %c0_3, %c0_4] : memref<1x32x5xf32, #tpu.memory_space<vmem>>, vector<1x32x4xf32>
    %3 = vector.shape_cast %2 : vector<1x32x4xf32> to vector<32x4xf32>
    %cst = arith.constant dense<0.000000e+00> : vector<32x256xf32>
    %4 = tpu.matmul %3, %1, %cst {dimension_numbers = #tpu.dot_dimension_numbers<[1], [0], [0], [1], [0, 0, 1, 1], [], []>} : vector<32x4xf32>, vector<4x256xf32>, vector<32x256xf32> -> vector<32x256xf32>
    %c0_5 = arith.constant 0 : index
    %c0_6 = arith.constant 0 : index
    %c4 = arith.constant 4 : index
    %5 = vector.load %arg3[%c0_5, %c0_6, %c4] : memref<1x32x5xf32, #tpu.memory_space<vmem>>, vector<1x32x1xf32>
    %6 = vector.shape_cast %5 : vector<1x32x1xf32> to vector<32x1xf32>
    %7 = vector.broadcast %6 : vector<32x1xf32> to vector<32x256xf32>
    %8 = arith.addf %4, %7 : vector<32x256xf32>
    %9 = arith.negf %8 : vector<32x256xf32>
    %10 = math.exp %9 : vector<32x256xf32>
    %cst_7 = arith.constant 1.000000e+00 : f32
    %11 = vector.broadcast %cst_7 : f32 to vector<32x256xf32>
    %12 = arith.addf %11, %10 : vector<32x256xf32>
    %13 = arith.divf %11, %12 : vector<32x256xf32>
    %14 = arith.mulf %8, %13 : vector<32x256xf32>
    %c0_8 = arith.constant 0 : index
    %c0_9 = arith.constant 0 : index
    %c0_10 = arith.constant 0 : index
    %15 = vector.load %arg4[%c0_8, %c0_9, %c0_10] : memref<1x3x33xf32, #tpu.memory_space<vmem>>, vector<1x3x32xf32>
    %16 = vector.shape_cast %15 : vector<1x3x32xf32> to vector<3x32xf32>
    %cst_11 = arith.constant dense<0.000000e+00> : vector<3x256xf32>
    %17 = tpu.matmul %16, %14, %cst_11 {dimension_numbers = #tpu.dot_dimension_numbers<[1], [0], [0], [1], [0, 0, 1, 1], [], []>} : vector<3x32xf32>, vector<32x256xf32>, vector<3x256xf32> -> vector<3x256xf32>
    %c0_12 = arith.constant 0 : index
    %c0_13 = arith.constant 0 : index
    %c32 = arith.constant 32 : index
    %18 = vector.load %arg4[%c0_12, %c0_13, %c32] : memref<1x3x33xf32, #tpu.memory_space<vmem>>, vector<1x3x1xf32>
    %19 = vector.shape_cast %18 : vector<1x3x1xf32> to vector<3x1xf32>
    %20 = vector.broadcast %19 : vector<3x1xf32> to vector<3x256xf32>
    %21 = arith.addf %17, %20 : vector<3x256xf32>
    %22 = vector.extract_strided_slice %1 {offsets = [0, 0], sizes = [3, 256], strides = [1, 1]} : vector<4x256xf32> to vector<3x256xf32>
    %23 = arith.addf %22, %21 : vector<3x256xf32>
    %c0_14 = arith.constant 0 : index
    %c0_15 = arith.constant 0 : index
    %c0_16 = arith.constant 0 : index
    %24 = vector.load %arg5[%c0_14, %c0_15, %c0_16] : memref<1x3x256xf32, #tpu.memory_space<vmem>>, vector<1x3x256xf32>
    %25 = vector.shape_cast %24 : vector<1x3x256xf32> to vector<3x256xf32>
    %26 = vector.shape_cast %23 : vector<3x256xf32> to vector<1x3x256xf32>
    tpu.vector_store %arg5[%c0_14, %c0_15, %c0_16], %26 {strides = array<i32>} : memref<1x3x256xf32, #tpu.memory_space<vmem>>, vector<1x3x256xf32>,
    return
  }
  func.func @transform_0(%arg0: i32, %arg1: i32) -> (i32, i32, i32) {
    %c0_i32 = arith.constant 0 : i32
    %c0_i32_0 = arith.constant 0 : i32
    return %arg0, %c0_i32, %arg1 : i32, i32, i32
  }
  func.func @transform_1(%arg0: i32, %arg1: i32) -> (i32, i32, i32) {
    %c0_i32 = arith.constant 0 : i32
    %c0_i32_0 = arith.constant 0 : i32
    %c0_i32_1 = arith.constant 0 : i32
    return %arg0, %c0_i32, %c0_i32_0 : i32, i32, i32
  }
  func.func @transform_2(%arg0: i32, %arg1: i32) -> (i32, i32, i32) {
    %c0_i32 = arith.constant 0 : i32
    %c0_i32_0 = arith.constant 0 : i32
    %c0_i32_1 = arith.constant 0 : i32
    return %arg0, %c0_i32, %c0_i32_0 : i32, i32, i32
  }
  func.func @transform_3(%arg0: i32, %arg1: i32) -> (i32, i32, i32) {
    %c0_i32 = arith.constant 0 : i32
    %c0_i32_0 = arith.constant 0 : i32
    return %arg0, %c0_i32, %arg1 : i32, i32, i32
  }
}

</mosaic_0001>

<bundles_post_ra>
// kernel: tpu_custom_call.1
= control target key start
LH: loop header
LB: loop body
LE: loop exit
PB: predicated region body
PF: predicated region fallthrough
CT: control target
= control target key end

     0   :  { %s780_s12 = smov 0   ;;  %s782_s13 = smov 0   ;;  %s838_s0 = inlined_call_operand.vmem [shape: f32[2,4,256], index: 0, kind: input, shape index: {}]   ;;  %s839_s1 = inlined_call_operand.vmem [shape: f32[2,32,5], index: 1, kind: input, shape index: {}]   ;;  %s840_s2 = inlined_call_operand.vmem [shape: f32[2,3,33], index: 2, kind: input, shape index: {}]   ;;  %s841_s3 = inlined_call_operand.vmem [shape: f32[2,3,256], index: 3, kind: output, shape index: {}]  }
   0x1   :  { %s784_s14 = smov 0  }
   0x2 LB: > { %s25_s15 = sadd.s32 1, %s751_s13  ;;  %p634_p0 = scmp.ge.s32.totalorder %s755_s14, 1  ;;  %s755_s14 = sphi %s784_s14, %s13_s14   ;;  %s751_s13 = sphi %s782_s13, %s843_s13   ;;  %s747_s12 = sphi %s780_s12, %s842_s12  }
   0x3   : > { %p27_p1 = scmp.ge.s32.totalorder %s25_s15, 2  ;;  %p177_p2 = scmp.lt.s32.totalorder %s755_s14, 3 }
   0x5   : > { %s845_s15 = smov (%p27_p1, %s25_s15), 0  ;;  %p178_p3 = pnand %p634_p0, %p177_p2 }
   0x6   : > { %p219_p4 = scmp.lt.s32.totalorder (!%p178_p3), %s747_s12, 1  ;;  %v757_v0 = vmov (!%p178_p3), 0.0   ;;  %v758_v1 = vmov (!%p178_p3), 4   ;;  %vm283_vm0 = vcmask (!%p178_p3), 1043456   ;;  %vm274_vm1 = vcmask (!%p178_p3), 31744  }
   0x7   : > { %181 = sbr.rel (%p178_p3) target bundleno = 504 (0x1f8), region = 32  ;;  %352 = vmatprep.mubr.f32.mxu0 (!%p178_p3), %v757_v0  ;;  %697 = vset.pattern.permute.xlu0 (!%p178_p3), %v758_v1  ;;  %v759_v9 = vmov (!%p178_p3), 32   ;;  %vm439_vm2 = vcmask (!%p178_p3), 261120  }
   0x8   : > { %698 = vset.pattern.permute.xlu1 (!%p178_p3), %v758_v1  ;;  %506 = vmatprep.mubr.f32.mxu1 (!%p178_p3), %v757_v0 }
   0xe   : > { %s847_s12 = smov (!%p219_p4, %s747_s12), 1 }
   0xf   : > { %s659_s16 = sshll.u32 %s847_s12, 3  ;;  %s660_s17 = sshll.u32 %s847_s12, 5 }
  0x10   : > { %s226_s20 = scalar_lea.vmem %s838_s0, %s659_s16  ;;  %s232_s23 = scalar_lea.vmem %s839_s1, %s660_s17 }
  0x11   : > { %v807_v2 = vld [vmem:[%s226_s20] sm:$0xff]  ;;  %v250_v5 = vld [vmem:[%s232_s23 + $0x10] sm:$0xff]  ;;  %v249_v6 = vld [vmem:[%s232_s23 + $0x8] sm:$0xff]  ;;  %s639_s24 = sshll.u32 %s847_s12, 2  ;;  %s245_s30 = scalar_lea.vmem %s841_s3, %s659_s16 }
  0x12   : > { %v273_v3 = vcombine.high %v807_v2, %v807_v2  ;;  %v248_v4 = vld [vmem:[%s232_s23] sm:$0xff]  ;;  %264 = vperm.xlu1 %698, %v250_v5   ;;  %v251_v7 = vld [vmem:[%s232_s23 + $0x18] sm:$0xff]  ;;  %s236_s27 = scalar_lea.vmem %s840_s2, %s639_s24 }
  0x13   : > { %254 = vperm.xlu0 %697, %v248_v4   ;;  %v819_v8 = vld [vmem:[%s236_s27] sm:$0x7] }
  0x14   : > { %642 = vmatprep.subr.msk.mxu0 %vm283_vm0, %v273_v3 }
  0x15   : > { %643 = vmatpush1.msk.msra.mxu0 %vm283_vm0, %v807_v2 }
  0x16   : > { %644 = vmatmul.mubr.msk.f32.vlgmr.msra.gmra.mrb[0].mxu0 %vm274_vm1, %v248_v4  ;;  %269 = vperm.xlu1 %698, %v251_v7  }
  0x17   : > { %358 = vmatprep.mubr.f32.mxu0 %v757_v0  ;;  %259 = vperm.xlu0 %697, %v249_v6  }
  0x1a   : > { %645 = vmatmul.mubr.msk.f32.gmra.mrb[2].mxu0 %vm274_vm1, %v249_v6 }
  0x1b   : > { %364 = vmatprep.mubr.f32.mxu0 %v757_v0  ;;  %699 = vset.pattern.permute.xlu0 %v759_v9 }
  0x1c   : > { %436 = vperm.xlu0 %699, %v819_v8  }
  0x1e   : > { %646 = vmatmul.mubr.msk.f32.gmra.mrb[4].mxu0 %vm274_vm1, %v250_v5 }
  0x1f   : > { %370 = vmatprep.mubr.f32.mxu0 %v757_v0 }
  0x22   : > { %647 = vmatmul.mubr.msk.f32.gmra.mrb[6].mxu0 %vm274_vm1, %v251_v7 }
  0x91   : > { %v265_v21 = vpop.permute.xlu1 %264 }
  0x92   : > { %v255_v10 = vpop.permute.xlu0 %254 }
  0x95   : > { %v270_v30 = vpop.permute.xlu1 %269 }
  0x96   : > { %v260_v15 = vpop.permute.xlu0 %259 }
  0xe9   : > { %v354_v11 = vpop.f32.mrb[0].mxu0 }
  0xea   : > { %v355_v12 = vadd.f32 %v354_v11, %v255_v10  ;;  %v356_v13 = vpop.f32.mrb[1].mxu0 }
  0xeb   : > { %v357_v14 = vadd.f32 %v356_v13, %v255_v10 }
  0xec   : > { %v648_v16 = vmul.f32 -1.442695, %v355_v12 }
  0xed   : > { %v649_v17 = vmul.f32 -1.442695, %v357_v14  ;;  %v360_v18 = vpop.f32.mrb[2].mxu0 }
  0xee   : > { %701 = vpow2.f32 %v648_v16  ;;  %v361_v19 = vadd.f32 %v360_v18, %v260_v15  ;;  %v362_v20 = vpop.f32.mrb[3].mxu0 }
  0xef   : > { %703 = vpow2.f32 %v649_v17  ;;  %v363_v22 = vadd.f32 %v362_v20, %v260_v15 }
  0xf0   : > { %v650_v23 = vmul.f32 -1.442695, %v361_v19 }
  0xf1   : > { %v651_v24 = vmul.f32 -1.442695, %v363_v22  ;;  %v366_v25 = vpop.f32.mrb[4].mxu0 }
  0xf2   : > { %705 = vpow2.f32 %v650_v23  ;;  %v367_v26 = vadd.f32 %v366_v25, %v265_v21  ;;  %v368_v27 = vpop.f32.mrb[5].mxu0 }
  0xf3   : > { %707 = vpow2.f32 %v651_v24  ;;  %v369_v28 = vadd.f32 %v368_v27, %v265_v21 }
  0xf4   : > { %v652_v29 = vmul.f32 -1.442695, %v367_v26 }
  0xf5   : > { %v653_v31 = vmul.f32 -1.442695, %v369_v28  ;;  %v372_v32 = vpop.f32.mrb[6].mxu0 }
  0xf6   : > { %709 = vpow2.f32 %v652_v29  ;;  %v373_v33 = vadd.f32 %v372_v32, %v270_v30  ;;  %v374_v34 = vpop.f32.mrb[7].mxu0 }
  0xf7   : > { %711 = vpow2.f32 %v653_v31  ;;  %v375_v35 = vadd.f32 %v374_v34, %v270_v30 }
  0xf8   : > { %v702_v36 = vpop.eup %701  ;;  %v654_v37 = vmul.f32 -1.442695, %v373_v33 }
  0xf9   : > { %v704_v38 = vpop.eup %703  ;;  %v401_v39 = vadd.f32 1.0, %v702_v36  ;;  %v655_v40 = vmul.f32 -1.442695, %v375_v35 }
  0xfa   : > { %v402_v41 = vadd.f32 1.0, %v704_v38  ;;  %713 = vpow2.f32 %v654_v37 }
  0xfb   : > { %715 = vrcp.f32 %v401_v39 }
  0xfc   : > { %v706_v42 = vpop.eup %705  ;;  %717 = vpow2.f32 %v655_v40 }
  0xfd   : > { %v708_v43 = vpop.eup %707  ;;  %v403_v44 = vadd.f32 1.0, %v706_v42  ;;  %719 = vrcp.f32 %v402_v41 }
  0xfe   : > { %v404_v45 = vadd.f32 1.0, %v708_v43 }
  0xff   : > { %721 = vrcp.f32 %v403_v44 }
 0x100   : > { %v710_v46 = vpop.eup %709  ;;  %723 = vrcp.f32 %v404_v45 }
 0x101   : > { %v712_v47 = vpop.eup %711  ;;  %v405_v48 = vadd.f32 1.0, %v710_v46 }
 0x102   : > { %v406_v50 = vadd.f32 1.0, %v712_v47 }
 0x103   : > { %725 = vrcp.f32 %v405_v48 }
 0x104   : > { %v714_v49 = vpop.eup %713 }
 0x105   : > { %v407_v51 = vadd.f32 1.0, %v714_v49  ;;  %v716_v52 = vpop.eup %715 }
 0x106   : > { %v718_v53 = vpop.eup %717  ;;  %v425_v58 = vmul.f32 %v716_v52, %v355_v12  ;;  %v437_v12 = vpop.permute.xlu0 %436 }
 0x107   : > { %727 = vrcp.f32 %v407_v51  ;;  %v720_v54 = vpop.eup %719  ;;  %v408_v55 = vadd.f32 1.0, %v718_v53 }
 0x108   : > { %729 = vrcp.f32 %v406_v50  ;;  %v426_v60 = vmul.f32 %v720_v54, %v357_v14 }
 0x109   : > { %v722_v56 = vpop.eup %721  ;;  %731 = vrcp.f32 %v408_v55 }
 0x10a   : > { %v724_v57 = vpop.eup %723  ;;  %v427_v59 = vmul.f32 %v722_v56, %v361_v19 }
 0x10b   : > { %v428_v61 = vmul.f32 %v724_v57, %v363_v22 }
 0x10c   : > { %v664_v62 = vpack.c.bf16 %v427_v59, %v425_v58 }
 0x10d   : > { %v662_v63 = vpack.c.bf16 %v428_v61, %v426_v60  ;;  %v726_v0 = vpop.eup %725 }
 0x10e   : > { %v429_v4 = vmul.f32 %v726_v0, %v367_v26 }
 0x10f   : > { %663 = vmatprep.subr.bf16.mxu1 %v662_v63 }
 0x110   : > { %665 = vmatpush1.bf16.msra.mxu1 %v664_v62 }
 0x111   : > { %v728_v1 = vpop.eup %727 }
 0x112   : > { %v730_v3 = vpop.eup %729  ;;  %v431_v5 = vmul.f32 %v728_v1, %v373_v33 }
 0x113   : > { %v732_v6 = vpop.eup %731  ;;  %v430_v9 = vmul.f32 %v730_v3, %v369_v28 }
 0x114   : > { %v668_v7 = vpack.c.bf16 %v431_v5, %v429_v4  ;;  %v432_v10 = vmul.f32 %v732_v6, %v375_v35 }
 0x116   : > { %v666_v11 = vpack.c.bf16 %v432_v10, %v430_v9 }
 0x118   : > { %667 = vmatprep.subr.bf16.mxu1 %v666_v11 }
 0x119   : > { %669 = vmatpush1.bf16.msra.mxu1 %v668_v7 }
 0x11c   : > { %656 = vmatmul.mubr.msk.f32.vlgmr.msra.gmra.mrb[0].mxu1 %vm439_vm2, %v819_v8 }
 0x1ef   : > { %v508_v13 = vpop.f32.mrb[0].mxu1 }
 0x1f0   : > { %v509_v14 = vadd.f32 %v508_v13, %v437_v12  ;;  %v510_v15 = vpop.f32.mrb[1].mxu1 }
 0x1f1   : > { %v511_v16 = vadd.f32 %v510_v15, %v437_v12 }
 0x1f3   : > { %v515_v17 = vcombine.low %v509_v14, %v511_v16 }
 0x1f5   : > { %v517_v18 = vadd.f32 %v515_v17, %v807_v2 }
 0x1f7   : > { %518 = vst [vmem:[%s245_s30] sm:$0x77] %v517_v18 }
 0x1f8 PF: > { %s13_s14 = sadd.s32 1, %s755_s14   ;;  %s842_s12 = smov %s751_s13 }
 0x1f9   : > { %p10_p5 = scmp.ge.s32.totalorder %s13_s14, 4   ;;  %s843_s13 = smov %s845_s15 }
 0x1fb   :  { %12 = sbr.rel (!%p10_p5) target bundleno = 2 (0x2), region = 68 }

</bundles_post_ra>
